<compile_context>
chip_gen: v5e
topology: v5e:2x2
jax: 0.10.0
libtpu: 0.0.40
codegen_flags: <defaults>
</compile_context>

<pallas_src>
import functools

import jax
import jax.numpy as jnp
from jax.experimental import pallas as pl
from jax.experimental.pallas import tpu as pltpu


_MIB = 1024 * 1024


def _round_up(x, m):
    return (x + m - 1) // m * m


def _valid_blocks(total):
    # Divisors usable as a sublane-dim block size: full dim, or a multiple of 8.
    return sorted(d for d in range(1, total + 1)
                  if total % d == 0 and (d == total or d % 8 == 0))


def _vmem_capacity_bytes():
    try:
        return int(pltpu.get_tpu_info().vmem_capacity_bytes)
    except Exception:
        return 64 * _MIB          # conservative (v7x-sized) fallback


def _make_kernel(num_segments, inv_hw, bc, c_total, c_steps):
    full_c = (bc == c_total)

    def kernel(x_ref, w_ref, b_ref, o_ref):
        # x_ref: (bn, T, bc, HW)  native dtype
        # w_ref: (C, NCp) f32 (resident)   b_ref: (1, NCp) f32   o_ref: (bn, NCp) f32
        j = pl.program_id(1)

        # temporal max over the segment axis (exact in the native dtype, VPU)
        z = x_ref[:, 0]
        for t in range(1, num_segments):
            z = jnp.maximum(z, x_ref[:, t])                       # (bn, bc, HW)

        # AdaptiveAvgPool2d(1): spatial mean over the full (untiled) HW axis, f32 acc
        pooled = jnp.sum(z.astype(jnp.float32), axis=-1) * inv_hw  # (bn, bc)

        if full_c:
            w_blk = w_ref[...]
        else:
            start = pl.multiple_of(j * bc, bc)
            w_blk = w_ref[pl.ds(start, bc), :]                    # resident weight slice

        contrib = jnp.dot(pooled, w_blk, preferred_element_type=jnp.float32)

        if c_steps == 1:
            # full-C path: single fused epilogue, no accumulator traffic
            o_ref[...] = contrib + b_ref[...]
        else:
            # C-tiled fallback: accumulate directly into the resident output block
            @pl.when(j == 0)
            def _():
                o_ref[...] = jnp.zeros_like(o_ref)

            o_ref[...] += contrib

            @pl.when(j == c_steps - 1)
            def _():
                o_ref[...] += b_ref[...]

    return kernel


def tmax_drop_savg_cls_forward(input_tensor, fc_weight, fc_bias, *,
                               num_segments, num_features, dprob=0.0):
    """input_tensor: (N*T, C*H*W); fc_weight: (num_classes, C); fc_bias: (num_classes,)."""
    # TODO(synk): nn.Dropout is implemented as inference-mode identity (no RNG mask).
    del dprob
    nt, chw = input_tensor.shape
    assert nt % num_segments == 0, (nt, num_segments)
    n = nt // num_segments
    assert chw % num_features == 0, (chw, num_features)
    hw = chw // num_features                       # pooling only needs HW, not H==W

    num_classes = fc_weight.shape[0]
    ncp = _round_up(num_classes, 128)              # lane-dense padded logits width

    # contiguous reshape -> (N, T, C, H*W); native dtype, no data movement / upcast
    x4 = jnp.asarray(input_tensor).reshape(n, num_segments, num_features, hw)
    itemsize = x4.dtype.itemsize

    # pre-pack fc params once: (NC, C) -> (C, NCp), bias -> (1, NCp)
    w_p = jnp.pad(jnp.transpose(jnp.asarray(fc_weight, jnp.float32)),
                  ((0, 0), (0, ncp - num_classes)))
    b_p = jnp.pad(jnp.asarray(fc_bias, jnp.float32),
                  (0, ncp - num_classes)).reshape(1, ncp)

    # ---- generation-aware block selection -------------------------------------
    vmem_cap = _vmem_capacity_bytes()
    # v5e/v6e (128 MiB physical VMEM): bigger streamed blocks; v7x (64 MiB): modest.
    x_budget = 12 * _MIB if vmem_cap >= 100 * _MIB else 6 * _MIB

    bn_cands = _valid_blocks(n)
    slab = num_segments * num_features * hw * itemsize      # per-n bytes at full C

    fitting = [d for d in bn_cands if d * slab <= x_budget]
    if fitting:
        # preferred path: full C, one contiguous HBM run per n
        bc = num_features
        multi = [d for d in fitting if n // d >= 2]         # keep >=2 N steps (v7x TC split)
        bn = max(multi) if multi else max(fitting)
    else:
        # fallback: smallest valid N block, tile over C and accumulate into o_ref
        bn = min(bn_cands)
        per_c = bn * num_segments * hw * itemsize
        bc_cands = _valid_blocks(num_features)
        bc_fit = [d for d in bc_cands if d * per_c <= x_budget]
        bc = max(bc_fit) if bc_fit else min(bc_cands)

    c_steps = num_features // bc
    grid = (n // bn, c_steps)

    # scoped VMEM: 2x streamed x block + resident weight/bias + output + f32 temps
    x_block_bytes = bn * num_segments * bc * hw * itemsize
    vmem_needed = (2 * x_block_bytes
                   + 2 * num_features * ncp * 4
                   + 2 * ncp * 4
                   + 2 * bn * ncp * 4
                   + 2 * bn * bc * hw * 4
                   + 4 * _MIB)
    vmem_limit = int(min(vmem_cap * 3 // 4, max(32 * _MIB, vmem_needed)))

    # advisory cost: fully HBM-bandwidth bound
    bytes_accessed = (x4.size * itemsize + w_p.size * 4 + b_p.size * 4 + n * ncp * 4)
    flops = n * num_features * hw * num_segments + 2 * n * num_features * ncp
    cost = pl.CostEstimate(flops=int(flops), transcendentals=0,
                           bytes_accessed=int(bytes_accessed))

    kernel = _make_kernel(num_segments, 1.0 / hw, bc, num_features, c_steps)

    out = pl.pallas_call(
        kernel,
        out_shape=jax.ShapeDtypeStruct((n, ncp), jnp.float32),
        grid_spec=pltpu.PrefetchScalarGridSpec(
            num_scalar_prefetch=0,
            grid=grid,
            in_specs=[
                pl.BlockSpec((bn, num_segments, bc, hw),
                             lambda i, j: (i, 0, j, 0)),
                pl.BlockSpec((num_features, ncp), lambda i, j: (0, 0)),  # resident W
                pl.BlockSpec((1, ncp), lambda i, j: (0, 0)),             # resident bias
            ],
            out_specs=pl.BlockSpec((bn, ncp), lambda i, j: (i, 0)),
        ),
        compiler_params=pltpu.CompilerParams(
            dimension_semantics=("parallel", "arbitrary"),
            vmem_limit_bytes=vmem_limit),
        cost_estimate=cost,
    )(x4, w_p, b_p)

    return out[:, :num_classes]


if __name__ == "__main__":
    key = jax.random.PRNGKey(0)
    kx, kw, kb = jax.random.split(key, 3)

    batch = 2
    num_segments = 8
    num_features = 32
    h = 16
    num_classes = 10
    dprob = 0.5   # inference-mode -> identity

    nt = batch * num_segments
    chw = num_features * h * h
    x = jax.random.normal(kx, (nt, chw), jnp.float32)
    fc_w = jax.random.normal(kw, (num_classes, num_features), jnp.float32) * 0.05
    fc_b = jax.random.normal(kb, (num_classes,), jnp.float32) * 0.05

    fwd = jax.jit(functools.partial(tmax_drop_savg_cls_forward,
                                    num_segments=num_segments,
                                    num_features=num_features,
                                    dprob=dprob))
    out = fwd(x, fc_w, fc_b)
    jax.block_until_ready(out)

    # pure-JAX reference (Dropout in eval mode is identity)
    x5 = x.reshape(batch, num_segments, num_features, h, h)
    z = jnp.max(x5, axis=1)
    pooled = jnp.mean(z, axis=(2, 3))
    ref = pooled @ fc_w.T + fc_b

    assert out.shape == (batch, num_classes), out.shape
    assert bool(jnp.all(jnp.isfinite(out)))
    assert bool(jnp.allclose(out, ref, atol=1e-4, rtol=1e-4)), \
        float(jnp.max(jnp.abs(out - ref)))
    print("KERNEL_OK")
</pallas_src>

<mosaic_0001>
module attributes {stable_mosaic.version = 11 : i64} {
  func.func @kernel(%arg0: i32, %arg1: i32, %arg2: memref<2x8x32x256xf32, #tpu.memory_space<vmem>>, %arg3: memref<32x128xf32, #tpu.memory_space<vmem>>, %arg4: memref<1x128xf32, #tpu.memory_space<vmem>>, %arg5: memref<2x128xf32, #tpu.memory_space<vmem>>) attributes {dimension_semantics = [#tpu.dimension_semantics<parallel>, #tpu.dimension_semantics<arbitrary>], iteration_bounds = array<i64: 1, 1>, scalar_prefetch = 0 : i64, scratch_operands = 0 : i64, tpu.core_type = #tpu.core_type<tc>, window_params = [{transform_indices = @transform_0, window_bounds = array<i64: 2, 8, 32, 256>}, {pipeline_mode = #tpu.pipeline_mode<synchronous>, transform_indices = @transform_1, window_bounds = array<i64: 32, 128>}, {pipeline_mode = #tpu.pipeline_mode<synchronous>, transform_indices = @transform_2, window_bounds = array<i64: 1, 128>}, {transform_indices = @transform_3, window_bounds = array<i64: 2, 128>}]} {
    %c0 = arith.constant 0 : index
    %c0_0 = arith.constant 0 : index
    %c0_1 = arith.constant 0 : index
    %c0_2 = arith.constant 0 : index
    %0 = vector.load %arg2[%c0, %c0_0, %c0_1, %c0_2] : memref<2x8x32x256xf32, #tpu.memory_space<vmem>>, vector<2x1x32x256xf32>
    %1 = vector.shape_cast %0 : vector<2x1x32x256xf32> to vector<2x32x256xf32>
    %c0_3 = arith.constant 0 : index
    %c1 = arith.constant 1 : index
    %c0_4 = arith.constant 0 : index
    %c0_5 = arith.constant 0 : index
    %2 = vector.load %arg2[%c0_3, %c1, %c0_4, %c0_5] : memref<2x8x32x256xf32, #tpu.memory_space<vmem>>, vector<2x1x32x256xf32>
    %3 = vector.shape_cast %2 : vector<2x1x32x256xf32> to vector<2x32x256xf32>
    %4 = arith.maximumf %1, %3 : vector<2x32x256xf32>
    %c0_6 = arith.constant 0 : index
    %c2 = arith.constant 2 : index
    %c0_7 = arith.constant 0 : index
    %c0_8 = arith.constant 0 : index
    %5 = vector.load %arg2[%c0_6, %c2, %c0_7, %c0_8] : memref<2x8x32x256xf32, #tpu.memory_space<vmem>>, vector<2x1x32x256xf32>
    %6 = vector.shape_cast %5 : vector<2x1x32x256xf32> to vector<2x32x256xf32>
    %7 = arith.maximumf %4, %6 : vector<2x32x256xf32>
    %c0_9 = arith.constant 0 : index
    %c3 = arith.constant 3 : index
    %c0_10 = arith.constant 0 : index
    %c0_11 = arith.constant 0 : index
    %8 = vector.load %arg2[%c0_9, %c3, %c0_10, %c0_11] : memref<2x8x32x256xf32, #tpu.memory_space<vmem>>, vector<2x1x32x256xf32>
    %9 = vector.shape_cast %8 : vector<2x1x32x256xf32> to vector<2x32x256xf32>
    %10 = arith.maximumf %7, %9 : vector<2x32x256xf32>
    %c0_12 = arith.constant 0 : index
    %c4 = arith.constant 4 : index
    %c0_13 = arith.constant 0 : index
    %c0_14 = arith.constant 0 : index
    %11 = vector.load %arg2[%c0_12, %c4, %c0_13, %c0_14] : memref<2x8x32x256xf32, #tpu.memory_space<vmem>>, vector<2x1x32x256xf32>
    %12 = vector.shape_cast %11 : vector<2x1x32x256xf32> to vector<2x32x256xf32>
    %13 = arith.maximumf %10, %12 : vector<2x32x256xf32>
    %c0_15 = arith.constant 0 : index
    %c5 = arith.constant 5 : index
    %c0_16 = arith.constant 0 : index
    %c0_17 = arith.constant 0 : index
    %14 = vector.load %arg2[%c0_15, %c5, %c0_16, %c0_17] : memref<2x8x32x256xf32, #tpu.memory_space<vmem>>, vector<2x1x32x256xf32>
    %15 = vector.shape_cast %14 : vector<2x1x32x256xf32> to vector<2x32x256xf32>
    %16 = arith.maximumf %13, %15 : vector<2x32x256xf32>
    %c0_18 = arith.constant 0 : index
    %c6 = arith.constant 6 : index
    %c0_19 = arith.constant 0 : index
    %c0_20 = arith.constant 0 : index
    %17 = vector.load %arg2[%c0_18, %c6, %c0_19, %c0_20] : memref<2x8x32x256xf32, #tpu.memory_space<vmem>>, vector<2x1x32x256xf32>
    %18 = vector.shape_cast %17 : vector<2x1x32x256xf32> to vector<2x32x256xf32>
    %19 = arith.maximumf %16, %18 : vector<2x32x256xf32>
    %c0_21 = arith.constant 0 : index
    %c7 = arith.constant 7 : index
    %c0_22 = arith.constant 0 : index
    %c0_23 = arith.constant 0 : index
    %20 = vector.load %arg2[%c0_21, %c7, %c0_22, %c0_23] : memref<2x8x32x256xf32, #tpu.memory_space<vmem>>, vector<2x1x32x256xf32>
    %21 = vector.shape_cast %20 : vector<2x1x32x256xf32> to vector<2x32x256xf32>
    %22 = arith.maximumf %19, %21 : vector<2x32x256xf32>
    %cst = arith.constant dense<0.000000e+00> : vector<2x32xf32>
    %23 = vector.multi_reduction <add>, %22, %cst [2] : vector<2x32x256xf32> to vector<2x32xf32>
    %cst_24 = arith.constant 3.906250e-03 : f32
    %24 = vector.broadcast %cst_24 : f32 to vector<2x32xf32>
    %25 = arith.mulf %23, %24 : vector<2x32xf32>
    %c0_25 = arith.constant 0 : index
    %c0_26 = arith.constant 0 : index
    %26 = vector.load %arg3[%c0_25, %c0_26] : memref<32x128xf32, #tpu.memory_space<vmem>>, vector<32x128xf32>
    %cst_27 = arith.constant dense<0.000000e+00> : vector<2x128xf32>
    %27 = tpu.matmul %25, %26, %cst_27 {dimension_numbers = #tpu.dot_dimension_numbers<[1], [0], [0], [1], [0, 0, 1, 1], [], []>} : vector<2x32xf32>, vector<32x128xf32>, vector<2x128xf32> -> vector<2x128xf32>
    %c0_28 = arith.constant 0 : index
    %c0_29 = arith.constant 0 : index
    %28 = vector.load %arg4[%c0_28, %c0_29] : memref<1x128xf32, #tpu.memory_space<vmem>>, vector<1x128xf32>
    %29 = vector.broadcast %28 : vector<1x128xf32> to vector<2x128xf32>
    %30 = arith.addf %27, %29 : vector<2x128xf32>
    %c0_30 = arith.constant 0 : index
    %c0_31 = arith.constant 0 : index
    %31 = vector.load %arg5[%c0_30, %c0_31] : memref<2x128xf32, #tpu.memory_space<vmem>>, vector<2x128xf32>
    tpu.vector_store %arg5[%c0_30, %c0_31], %30 {strides = array<i32>} : memref<2x128xf32, #tpu.memory_space<vmem>>, vector<2x128xf32>,
    return
  }
  func.func @transform_0(%arg0: i32, %arg1: i32) -> (i32, i32, i32, i32) {
    %c0_i32 = arith.constant 0 : i32
    %c0_i32_0 = arith.constant 0 : i32
    %c0_i32_1 = arith.constant 0 : i32
    return %arg0, %c0_i32, %arg1, %c0_i32_0 : i32, i32, i32, i32
  }
  func.func @transform_1(%arg0: i32, %arg1: i32) -> (i32, i32) {
    %c0_i32 = arith.constant 0 : i32
    %c0_i32_0 = arith.constant 0 : i32
    %c0_i32_1 = arith.constant 0 : i32
    return %c0_i32, %c0_i32_0 : i32, i32
  }
  func.func @transform_2(%arg0: i32, %arg1: i32) -> (i32, i32) {
    %c0_i32 = arith.constant 0 : i32
    %c0_i32_0 = arith.constant 0 : i32
    %c0_i32_1 = arith.constant 0 : i32
    return %c0_i32, %c0_i32_0 : i32, i32
  }
  func.func @transform_3(%arg0: i32, %arg1: i32) -> (i32, i32) {
    %c0_i32 = arith.constant 0 : i32
    %c0_i32_0 = arith.constant 0 : i32
    return %arg0, %c0_i32 : i32, i32
  }
}

</mosaic_0001>

<bundles_post_ra>
// kernel: tmax_drop_savg_cls_forward.1
= control target key start
LH: loop header
LB: loop body
LE: loop exit
PB: predicated region body
PF: predicated region fallthrough
CT: control target
= control target key end

     0   :  { %s938_s0 = inlined_call_operand.vmem [shape: f32[2,8,32,256], index: 0, kind: input, shape index: {}]   ;;  %s939_s1 = inlined_call_operand.vmem [shape: f32[32,128], index: 1, kind: input, shape index: {}]   ;;  %s940_s2 = inlined_call_operand.vmem [shape: f32[1,128], index: 2, kind: input, shape index: {}]   ;;  %s941_s3 = inlined_call_operand.hbm [shape: f32[2,128], index: 3, kind: output, shape index: {}]  }
   0x1   :  { %v23_v0 = vld [vmem:[%s938_s0 + $0x200] sm:$0xff]  ;;  %v24_v1 = vld [vmem:[%s938_s0 + $0x208] sm:$0xff] }
   0x2   :  { %v382_v2 = vld [vmem:[%s938_s0 + $0x240] sm:$0xff]  ;;  %v383_v3 = vld [vmem:[%s938_s0 + $0x248] sm:$0xff] }
   0x3   :  { %v56_v4 = vmax.f32 %v23_v0, %v382_v2  ;;  %v398_v5 = vld [vmem:[%s938_s0 + $0x280] sm:$0xff]  ;;  %v399_v6 = vld [vmem:[%s938_s0 + $0x288] sm:$0xff]  ;;  %v57_v7 = vmax.f32 %v24_v1, %v383_v3 }
   0x4   :  { %v414_v8 = vld [vmem:[%s938_s0 + $0x2c0] sm:$0xff]  ;;  %v415_v10 = vld [vmem:[%s938_s0 + $0x2c8] sm:$0xff] }
   0x5   :  { %v89_v9 = vmax.f32 %v56_v4, %v398_v5  ;;  %v90_v11 = vmax.f32 %v57_v7, %v399_v6  ;;  %v430_v12 = vld [vmem:[%s938_s0 + $0x300] sm:$0xff]  ;;  %v431_v13 = vld [vmem:[%s938_s0 + $0x308] sm:$0xff] }
   0x6   :  { %v446_v14 = vld [vmem:[%s938_s0 + $0x340] sm:$0xff]  ;;  %v447_v16 = vld [vmem:[%s938_s0 + $0x348] sm:$0xff] }
   0x7   :  { %v122_v15 = vmax.f32 %v89_v9, %v414_v8  ;;  %v15_v17 = vld [vmem:[%s938_s0] sm:$0xff]  ;;  %v16_v18 = vld [vmem:[%s938_s0 + $0x8] sm:$0xff]  ;;  %v123_v19 = vmax.f32 %v90_v11, %v415_v10  ;;  %v25_v11 = vld [vmem:[%s938_s0 + $0x210] sm:$0xff] }
   0x8   :  { %v374_v20 = vld [vmem:[%s938_s0 + $0x40] sm:$0xff]  ;;  %v375_v21 = vld [vmem:[%s938_s0 + $0x48] sm:$0xff] }
   0x9   :  { %v390_v22 = vld [vmem:[%s938_s0 + $0x80] sm:$0xff]  ;;  %v155_v23 = vmax.f32 %v122_v15, %v430_v12  ;;  %v463_v25 = vld [vmem:[%s938_s0 + $0x388] sm:$0xff]  ;;  %v48_v26 = vmax.f32 %v15_v17, %v374_v20  ;;  %v49_v27 = vmax.f32 %v16_v18, %v375_v21  ;;  %v156_v29 = vmax.f32 %v123_v19, %v431_v13  ;;  %v26_v12 = vld [vmem:[%s938_s0 + $0x218] sm:$0xff] }
   0xa   :  { %v462_v24 = vld [vmem:[%s938_s0 + $0x380] sm:$0xff]  ;;  %v391_v28 = vld [vmem:[%s938_s0 + $0x88] sm:$0xff]  ;;  %v384_v13 = vld [vmem:[%s938_s0 + $0x250] sm:$0xff] }
   0xb   :  { %v478_v30 = vld [vmem:[%s938_s0 + $0x3c0] sm:$0xff]  ;;  %v407_v32 = vld [vmem:[%s938_s0 + $0xc8] sm:$0xff]  ;;  %v188_v33 = vmax.f32 %v155_v23, %v446_v14  ;;  %v81_v35 = vmax.f32 %v48_v26, %v390_v22  ;;  %v82_v36 = vmax.f32 %v49_v27, %v391_v28  ;;  %v189_v39 = vmax.f32 %v156_v29, %v447_v16  ;;  %v385_v16 = vld [vmem:[%s938_s0 + $0x258] sm:$0xff] }
   0xc   :  { %v406_v31 = vld [vmem:[%s938_s0 + $0xc0] sm:$0xff]  ;;  %v479_v34 = vld [vmem:[%s938_s0 + $0x3c8] sm:$0xff]  ;;  %v58_v17 = vmax.f32 %v25_v11, %v384_v13  ;;  %v400_v18 = vld [vmem:[%s938_s0 + $0x290] sm:$0xff] }
   0xd   :  { %v422_v37 = vld [vmem:[%s938_s0 + $0x100] sm:$0xff]  ;;  %v423_v38 = vld [vmem:[%s938_s0 + $0x108] sm:$0xff]  ;;  %v221_v43 = vmax.f32 %v188_v33, %v462_v24  ;;  %v114_v44 = vmax.f32 %v81_v35, %v406_v31  ;;  %v115_v45 = vmax.f32 %v82_v36, %v407_v32  ;;  %v222_v49 = vmax.f32 %v189_v39, %v463_v25  ;;  %v401_v19 = vld [vmem:[%s938_s0 + $0x298] sm:$0xff] }
   0xe   :  { %v438_v40 = vld [vmem:[%s938_s0 + $0x140] sm:$0xff]  ;;  %v439_v41 = vld [vmem:[%s938_s0 + $0x148] sm:$0xff]  ;;  %v59_v24 = vmax.f32 %v26_v12, %v385_v16  ;;  %v416_v25 = vld [vmem:[%s938_s0 + $0x2d0] sm:$0xff] }
   0xf   :  { %v19_v42 = vld [vmem:[%s938_s0 + $0x20] sm:$0xff]  ;;  %v20_v46 = vld [vmem:[%s938_s0 + $0x28] sm:$0xff]  ;;  %v254_v55 = vmax.f32 %v221_v43, %v478_v30  ;;  %v147_v56 = vmax.f32 %v114_v44, %v422_v37  ;;  %v148_v57 = vmax.f32 %v115_v45, %v423_v38  ;;  %v255_v61 = vmax.f32 %v222_v49, %v479_v34  ;;  %v417_v31 = vld [vmem:[%s938_s0 + $0x2d8] sm:$0xff] }
  0x10   :  { %v378_v47 = vld [vmem:[%s938_s0 + $0x60] sm:$0xff]  ;;  %v379_v48 = vld [vmem:[%s938_s0 + $0x68] sm:$0xff]  ;;  %v91_v30 = vmax.f32 %v58_v17, %v400_v18  ;;  %v92_v34 = vmax.f32 %v59_v24, %v401_v19  ;;  %v432_v35 = vld [vmem:[%s938_s0 + $0x310] sm:$0xff] }
  0x11   :  { %v454_v50 = vld [vmem:[%s938_s0 + $0x180] sm:$0xff]  ;;  %v52_v51 = vmax.f32 %v19_v42, %v378_v47  ;;  %v53_v52 = vmax.f32 %v20_v46, %v379_v48  ;;  %v395_v54 = vld [vmem:[%s938_s0 + $0xa8] sm:$0xff]  ;;  %v180_v3 = vmax.f32 %v147_v56, %v438_v40  ;;  %v181_v4 = vmax.f32 %v148_v57, %v439_v41  ;;  %v433_v36 = vld [vmem:[%s938_s0 + $0x318] sm:$0xff] }
  0x12   :  { %v394_v53 = vld [vmem:[%s938_s0 + $0xa0] sm:$0xff]  ;;  %v455_v58 = vld [vmem:[%s938_s0 + $0x188] sm:$0xff]  ;;  %v274_v8 = vadd.f32 %v255_v61, %v254_v55  ;;  %v448_v37 = vld [vmem:[%s938_s0 + $0x350] sm:$0xff]  ;;  %v124_v39 = vmax.f32 %v91_v30, %v416_v25  ;;  %v125_v45 = vmax.f32 %v92_v34, %v417_v31 }
  0x13   :  { %v410_v59 = vld [vmem:[%s938_s0 + $0xe0] sm:$0xff]  ;;  %v411_v60 = vld [vmem:[%s938_s0 + $0xe8] sm:$0xff]  ;;  %v85_v0 = vmax.f32 %v52_v51, %v394_v53  ;;  %v86_v1 = vmax.f32 %v53_v52, %v395_v54  ;;  %v213_v14 = vmax.f32 %v180_v3, %v454_v50  ;;  %v214_v15 = vmax.f32 %v181_v4, %v455_v58  ;;  %v449_v40 = vld [vmem:[%s938_s0 + $0x358] sm:$0xff] }
  0x14   :  { %v470_v62 = vld [vmem:[%s938_s0 + $0x1c0] sm:$0xff]  ;;  %v471_v63 = vld [vmem:[%s938_s0 + $0x1c8] sm:$0xff]  ;;  %275 = vadd.xlane.f32.xlu1 %v274_v8  ;;  %v17_v41 = vld [vmem:[%s938_s0 + $0x10] sm:$0xff]  ;;  %v157_v49 = vmax.f32 %v124_v39, %v432_v35  ;;  %v158_v57 = vmax.f32 %v125_v45, %v433_v36 }
  0x15   :  { %v426_v2 = vld [vmem:[%s938_s0 + $0x120] sm:$0xff]  ;;  %v427_v5 = vld [vmem:[%s938_s0 + $0x128] sm:$0xff]  ;;  %v118_v9 = vmax.f32 %v85_v0, %v410_v59  ;;  %v119_v10 = vmax.f32 %v86_v1, %v411_v60  ;;  %v246_v26 = vmax.f32 %v213_v14, %v470_v62  ;;  %v247_v27 = vmax.f32 %v214_v15, %v471_v63  ;;  %v18_v42 = vld [vmem:[%s938_s0 + $0x18] sm:$0xff] }
  0x16   :  { %v442_v6 = vld [vmem:[%s938_s0 + $0x160] sm:$0xff]  ;;  %v443_v7 = vld [vmem:[%s938_s0 + $0x168] sm:$0xff]  ;;  %v376_v46 = vld [vmem:[%s938_s0 + $0x50] sm:$0xff]  ;;  %v190_v61 = vmax.f32 %v157_v49, %v448_v37  ;;  %v191_v4 = vmax.f32 %v158_v57, %v449_v40 }
  0x17   :  { %v151_v20 = vmax.f32 %v118_v9, %v426_v2  ;;  %v152_v21 = vmax.f32 %v119_v10, %v427_v5  ;;  %v458_v22 = vld [vmem:[%s938_s0 + $0x1a0] sm:$0xff]  ;;  %v459_v23 = vld [vmem:[%s938_s0 + $0x1a8] sm:$0xff]  ;;  %v262_v38 = vadd.f32 %v247_v27, %v246_v26  ;;  %v377_v47 = vld [vmem:[%s938_s0 + $0x58] sm:$0xff]  ;;  %v50_v52 = vmax.f32 %v17_v41, %v376_v46 }
  0x18   :  { %v474_v28 = vld [vmem:[%s938_s0 + $0x1e0] sm:$0xff]  ;;  %v475_v29 = vld [vmem:[%s938_s0 + $0x1e8] sm:$0xff]  ;;  %v392_v48 = vld [vmem:[%s938_s0 + $0x90] sm:$0xff]  ;;  %v51_v53 = vmax.f32 %v18_v42, %v377_v47 }
  0x19   :  { %v184_v32 = vmax.f32 %v151_v20, %v442_v6  ;;  %v185_v33 = vmax.f32 %v152_v21, %v443_v7  ;;  %263 = vadd.xlane.f32.xlu0 %v262_v38  ;;  %v464_v50 = vld [vmem:[%s938_s0 + $0x390] sm:$0xff]  ;;  %v465_v51 = vld [vmem:[%s938_s0 + $0x398] sm:$0xff]  ;;  %v83_v63 = vmax.f32 %v50_v52, %v392_v48  ;;  %v27_v7 = vld [vmem:[%s938_s0 + $0x220] sm:$0xff] }
  0x1a   :  { %v393_v54 = vld [vmem:[%s938_s0 + $0x98] sm:$0xff]  ;;  %v480_v58 = vld [vmem:[%s938_s0 + $0x3d0] sm:$0xff]  ;;  %v223_v8 = vmax.f32 %v190_v61, %v464_v50  ;;  %v28_v11 = vld [vmem:[%s938_s0 + $0x228] sm:$0xff]  ;;  %v224_v14 = vmax.f32 %v191_v4, %v465_v51 }
  0x1b   :  { %v217_v43 = vmax.f32 %v184_v32, %v458_v22  ;;  %v218_v44 = vmax.f32 %v185_v33, %v459_v23  ;;  %v408_v59 = vld [vmem:[%s938_s0 + $0xd0] sm:$0xff]  ;;  %v409_v60 = vld [vmem:[%s938_s0 + $0xd8] sm:$0xff]  ;;  %v84_v0 = vmax.f32 %v51_v53, %v393_v54  ;;  %v386_v12 = vld [vmem:[%s938_s0 + $0x260] sm:$0xff] }
  0x1c   :  { %v481_v62 = vld [vmem:[%s938_s0 + $0x3d8] sm:$0xff]  ;;  %v424_v1 = vld [vmem:[%s938_s0 + $0x110] sm:$0xff]  ;;  %v116_v9 = vmax.f32 %v83_v63, %v408_v59  ;;  %v387_v13 = vld [vmem:[%s938_s0 + $0x268] sm:$0xff]  ;;  %v60_v16 = vmax.f32 %v27_v7, %v386_v12  ;;  %v256_v20 = vmax.f32 %v223_v8, %v480_v58 }
  0x1d   :  { %v250_v55 = vmax.f32 %v217_v43, %v474_v28  ;;  %v251_v56 = vmax.f32 %v218_v44, %v475_v29  ;;  %v425_v2 = vld [vmem:[%s938_s0 + $0x118] sm:$0xff]  ;;  %v440_v5 = vld [vmem:[%s938_s0 + $0x150] sm:$0xff]  ;;  %v117_v10 = vmax.f32 %v84_v0, %v409_v60  ;;  %v61_v17 = vmax.f32 %v28_v11, %v387_v13  ;;  %v402_v18 = vld [vmem:[%s938_s0 + $0x2a0] sm:$0xff] }
  0x1e   :  { %v441_v6 = vld [vmem:[%s938_s0 + $0x158] sm:$0xff]  ;;  %v456_v15 = vld [vmem:[%s938_s0 + $0x190] sm:$0xff]  ;;  %v403_v19 = vld [vmem:[%s938_s0 + $0x2a8] sm:$0xff]  ;;  %v149_v21 = vmax.f32 %v116_v9, %v424_v1  ;;  %v257_v26 = vmax.f32 %v224_v14, %v481_v62  ;;  %v93_v29 = vmax.f32 %v60_v16, %v402_v18 }
  0x1f   :  { %v268_v3 = vadd.f32 %v251_v56, %v250_v55  ;;  %v150_v22 = vmax.f32 %v117_v10, %v425_v2  ;;  %v457_v23 = vld [vmem:[%s938_s0 + $0x198] sm:$0xff]  ;;  %v418_v24 = vld [vmem:[%s938_s0 + $0x2e0] sm:$0xff]  ;;  %v419_v25 = vld [vmem:[%s938_s0 + $0x2e8] sm:$0xff]  ;;  %v94_v30 = vmax.f32 %v61_v17, %v403_v19 }
  0x20   :  { %v472_v27 = vld [vmem:[%s938_s0 + $0x1d0] sm:$0xff]  ;;  %v473_v28 = vld [vmem:[%s938_s0 + $0x1d8] sm:$0xff]  ;;  %v434_v31 = vld [vmem:[%s938_s0 + $0x320] sm:$0xff]  ;;  %v182_v32 = vmax.f32 %v149_v21, %v440_v5  ;;  %v277_v37 = vadd.f32 %v257_v26, %v256_v20  ;;  %v126_v38 = vmax.f32 %v93_v29, %v418_v24 }
  0x21   :  { %269 = vadd.xlane.f32.xlu2 %v268_v3  ;;  %v183_v33 = vmax.f32 %v150_v22, %v441_v6  ;;  %v435_v34 = vld [vmem:[%s938_s0 + $0x328] sm:$0xff]  ;;  %v450_v35 = vld [vmem:[%s938_s0 + $0x360] sm:$0xff]  ;;  %v127_v39 = vmax.f32 %v94_v30, %v419_v25  ;;  %v29_v40 = vld [vmem:[%s938_s0 + $0x230] sm:$0xff] }
  0x22   :  { %v451_v36 = vld [vmem:[%s938_s0 + $0x368] sm:$0xff]  ;;  %v30_v41 = vld [vmem:[%s938_s0 + $0x238] sm:$0xff]  ;;  %v388_v42 = vld [vmem:[%s938_s0 + $0x270] sm:$0xff]  ;;  %v215_v43 = vmax.f32 %v182_v32, %v456_v15  ;;  %278 = vadd.xlane.f32.xlu1 %v277_v37  ;;  %v159_v49 = vmax.f32 %v126_v38, %v434_v31 }
  0x23   :  { %v216_v44 = vmax.f32 %v183_v33, %v457_v23  ;;  %v389_v45 = vld [vmem:[%s938_s0 + $0x278] sm:$0xff]  ;;  %v62_v46 = vmax.f32 %v29_v40, %v388_v42  ;;  %v404_v47 = vld [vmem:[%s938_s0 + $0x2b0] sm:$0xff]  ;;  %v160_v50 = vmax.f32 %v127_v39, %v435_v34  ;;  %v466_v51 = vld [vmem:[%s938_s0 + $0x3a0] sm:$0xff] }
  0x24   :  { %v405_v48 = vld [vmem:[%s938_s0 + $0x2b8] sm:$0xff]  ;;  %v63_v52 = vmax.f32 %v30_v41, %v389_v45  ;;  %v420_v53 = vld [vmem:[%s938_s0 + $0x2f0] sm:$0xff]  ;;  %v248_v54 = vmax.f32 %v215_v43, %v472_v27  ;;  %v467_v56 = vld [vmem:[%s938_s0 + $0x3a8] sm:$0xff]  ;;  %v192_v60 = vmax.f32 %v159_v49, %v450_v35 }
  0x25   :  { %v249_v55 = vmax.f32 %v216_v44, %v473_v28  ;;  %v482_v57 = vld [vmem:[%s938_s0 + $0x3e0] sm:$0xff]  ;;  %v95_v58 = vmax.f32 %v62_v46, %v404_v47  ;;  %v421_v59 = vld [vmem:[%s938_s0 + $0x2f8] sm:$0xff]  ;;  %v193_v61 = vmax.f32 %v160_v50, %v451_v36  ;;  %v483_v62 = vld [vmem:[%s938_s0 + $0x3e8] sm:$0xff] }
  0x26   :  { %v96_v63 = vmax.f32 %v63_v52, %v405_v48  ;;  %v436_v0 = vld [vmem:[%s938_s0 + $0x330] sm:$0xff]  ;;  %v437_v1 = vld [vmem:[%s938_s0 + $0x338] sm:$0xff]  ;;  %v225_v7 = vmax.f32 %v192_v60, %v466_v51 }
  0x27   :  { %v265_v2 = vadd.f32 %v249_v55, %v248_v54  ;;  %v128_v3 = vmax.f32 %v95_v58, %v420_v53  ;;  %v452_v4 = vld [vmem:[%s938_s0 + $0x370] sm:$0xff]  ;;  %v22_v6 = vld [vmem:[%s938_s0 + $0x38] sm:$0xff]  ;;  %v226_v8 = vmax.f32 %v193_v61, %v467_v56 }
  0x28   :  { %v21_v5 = vld [vmem:[%s938_s0 + $0x30] sm:$0xff]  ;;  %v129_v9 = vmax.f32 %v96_v63, %v421_v59  ;;  %v381_v11 = vld [vmem:[%s938_s0 + $0x78] sm:$0xff]  ;;  %v258_v18 = vmax.f32 %v225_v7, %v482_v57 }
  0x29   :  { %v380_v10 = vld [vmem:[%s938_s0 + $0x70] sm:$0xff]  ;;  %266 = vadd.xlane.f32.xlu0 %v265_v2  ;;  %v161_v13 = vmax.f32 %v128_v3, %v436_v0  ;;  %v453_v14 = vld [vmem:[%s938_s0 + $0x378] sm:$0xff]  ;;  %v55_v16 = vmax.f32 %v22_v6, %v381_v11  ;;  %v259_v19 = vmax.f32 %v226_v8, %v483_v62 }
  0x2a   :  { %v396_v12 = vld [vmem:[%s938_s0 + $0xb0] sm:$0xff]  ;;  %v54_v15 = vmax.f32 %v21_v5, %v380_v10  ;;  %v397_v17 = vld [vmem:[%s938_s0 + $0xb8] sm:$0xff]  ;;  %v162_v20 = vmax.f32 %v129_v9, %v437_v1 }
  0x2b   :  { %v468_v21 = vld [vmem:[%s938_s0 + $0x3b0] sm:$0xff]  ;;  %v413_v23 = vld [vmem:[%s938_s0 + $0xf8] sm:$0xff]  ;;  %v194_v24 = vmax.f32 %v161_v13, %v452_v4  ;;  %v88_v28 = vmax.f32 %v55_v16, %v397_v17  ;;  %v280_v29 = vadd.f32 %v259_v19, %v258_v18 }
  0x2c   :  { %v412_v22 = vld [vmem:[%s938_s0 + $0xf0] sm:$0xff]  ;;  %v469_v25 = vld [vmem:[%s938_s0 + $0x3b8] sm:$0xff]  ;;  %v87_v27 = vmax.f32 %v54_v15, %v396_v12  ;;  %v195_v30 = vmax.f32 %v162_v20, %v453_v14 }
  0x2d   :  { %v484_v26 = vld [vmem:[%s938_s0 + $0x3f0] sm:$0xff]  ;;  %v429_v32 = vld [vmem:[%s938_s0 + $0x138] sm:$0xff]  ;;  %v227_v33 = vmax.f32 %v194_v24, %v468_v21  ;;  %v121_v36 = vmax.f32 %v88_v28, %v413_v23 }
  0x2e   :  { %v428_v31 = vld [vmem:[%s938_s0 + $0x130] sm:$0xff]  ;;  %v485_v34 = vld [vmem:[%s938_s0 + $0x3f8] sm:$0xff]  ;;  %v120_v35 = vmax.f32 %v87_v27, %v412_v22 }
  0x2f   :  { %8 = vsyncpa [#allocation3], 0  ;;  %281 = vadd.xlane.f32.xlu2 %v280_v29  ;;  %v228_v37 = vmax.f32 %v195_v30, %v469_v25  ;;  %v444_v38 = vld [vmem:[%s938_s0 + $0x170] sm:$0xff]  ;;  %v445_v39 = vld [vmem:[%s938_s0 + $0x178] sm:$0xff]  ;;  %v260_v40 = vmax.f32 %v227_v33, %v484_v26  ;;  %v154_v42 = vmax.f32 %v121_v36, %v429_v32  ;;  %v310_v63 = vlaneseq  ;;  %s515_s6 = smov [#allocation2]   ;;  %s365_s10 = sshll.u32 %s941_s3, 4  ;;  %s366_s10 = int_to_ptr.hbm [resolvable:$true] %s365_s10 }
  0x30   :  { %v153_v41 = vmax.f32 %v120_v35, %v428_v31  ;;  %v460_v44 = vld [vmem:[%s938_s0 + $0x1b0] sm:$0xff]  ;;  %v461_v45 = vld [vmem:[%s938_s0 + $0x1b8] sm:$0xff]  ;;  %v295_v58 = vld [vmem:[%s939_s1 + $0x8] sm:$0xff]  ;;  %vm315_vm0 = vcmask 130112   ;;  %vm319_vm1 = vcmask 195712   ;;  %vm323_vm2 = vcmask 261312  }
  0x31   :  { %v261_v43 = vmax.f32 %v228_v37, %v485_v34  ;;  %v187_v47 = vmax.f32 %v154_v42, %v445_v39  ;;  %v476_v49 = vld [vmem:[%s938_s0 + $0x1f0] sm:$0xff]  ;;  %v477_v50 = vld [vmem:[%s938_s0 + $0x1f8] sm:$0xff]  ;;  %v294_v59 = vld [vmem:[%s939_s1] sm:$0xff]  ;;  %v311_v1 = vand.u32 127, %v310_v63  ;;  %vm332_vm3 = vcmask 1041409   ;;  %s363_s7 = sshll.u32 %s515_s6, 4  ;;  %s364_s7 = int_to_ptr.vmem [resolvable:$true] %s363_s7 }
  0x32   :  { %v186_v46 = vmax.f32 %v153_v41, %v444_v38  ;;  %v297_v56 = vld [vmem:[%s939_s1 + $0x18] sm:$0xff]  ;;  %v296_v57 = vld [vmem:[%s939_s1 + $0x10] sm:$0xff]  ;;  %vm334_vm4 = vcmask 261120   ;;  %v488_v32 = vld [vmem:[%s940_s2] ss:$0 sm:$0xff] }
  0x33   :  { %v283_v48 = vadd.f32 %v261_v43, %v260_v40  ;;  %v220_v52 = vmax.f32 %v187_v47, %v461_v45  ;;  %349 = vmatpush.msra.mxu0 %v297_v56  ;;  %v313_v3 = vadd.s32 4294967288, %v311_v1  ;;  %v321_v11 = vadd.s32 4294967272, %v311_v1 }
  0x34   :  { %v219_v51 = vmax.f32 %v186_v46, %v460_v44  ;;  %v317_v13 = vadd.s32 4294967280, %v311_v1 }
  0x35   :  { %284 = vadd.xlane.f32.xlu1 %v283_v48  ;;  %v253_v54 = vmax.f32 %v220_v52, %v477_v50  ;;  %350 = vmatpush.msra.mxu0 %v296_v57 }
  0x36   :  { %v252_v53 = vmax.f32 %v219_v51, %v476_v49 }
  0x37   :  { %351 = vmatpush.msra.mxu0 %v295_v58 }
  0x38   :  { %v271_v55 = vadd.f32 %v253_v54, %v252_v53 }
  0x39   :  { %352 = vmatpush.msra.mxu0 %v294_v59 }
  0x3a   :  { %272 = vadd.xlane.f32.xlu0 %v271_v55 }
  0x87   :  { %v276_v60 = vpop.xlane.xlu1 %275 }
  0x88   :  { %v290_v6 = vmul.f32 0.00390625, %v276_v60 }
  0x8a   :  { %v325_v15 = vperm.slane %v290_v6, %v311_v1 }
  0x8c   :  { %v264_v61 = vpop.xlane.xlu0 %263 }
  0x8d   :  { %v286_v9 = vmul.f32 0.00390625, %v264_v61 }
  0x8f   :  { %v312_v19 = vperm.slane %v286_v9, %v311_v1 }
  0x94   :  { %v270_v62 = vpop.xlane.xlu2 %269 }
  0x95   :  { %v279_v0 = vpop.xlane.xlu1 %278  ;;  %v288_v17 = vmul.f32 0.00390625, %v270_v62 }
  0x96   :  { %v291_v4 = vmul.f32 0.00390625, %v279_v0 }
  0x97   :  { %v318_v25 = vperm.slane %v288_v17, %v317_v13 }
  0x98   :  { %v326_v10 = vperm.slane %v291_v4, %v313_v3 }
  0x9a   :  { %v327_v20 = vsel %vm315_vm0, %v326_v10, %v325_v15 }
  0x9c   :  { %v267_v2 = vpop.xlane.xlu0 %266 }
  0x9d   :  { %v287_v7 = vmul.f32 0.00390625, %v267_v2 }
  0x9f   :  { %v314_v16 = vperm.slane %v287_v7, %v313_v3 }
  0xa1   :  { %v316_v23 = vsel %vm315_vm0, %v314_v16, %v312_v19 }
  0xa2   :  { %v282_v5 = vpop.xlane.xlu2 %281  ;;  %v320_v29 = vsel %vm319_vm1, %v318_v25, %v316_v23 }
  0xa3   :  { %v292_v8 = vmul.f32 0.00390625, %v282_v5 }
  0xa5   :  { %v328_v18 = vperm.slane %v292_v8, %v317_v13 }
  0xa7   :  { %v329_v26 = vsel %vm319_vm1, %v328_v18, %v327_v20 }
  0xa8   :  { %v285_v12 = vpop.xlane.xlu1 %284 }
  0xa9   :  { %v293_v14 = vmul.f32 0.00390625, %v285_v12 }
  0xab   :  { %v330_v21 = vperm.slane %v293_v14, %v321_v11 }
  0xad   :  { %v273_v22 = vpop.xlane.xlu0 %272  ;;  %v331_v28 = vsel %vm323_vm2, %v330_v21, %v329_v26 }
  0xae   :  { %v289_v24 = vmul.f32 0.00390625, %v273_v22 }
  0xb0   :  { %v322_v27 = vperm.slane %v289_v24, %v321_v11 }
  0xb2   :  { %v324_v30 = vsel %vm323_vm2, %v322_v27, %v320_v29 }
  0xb3   :  { %v333_v31 = vsel %vm332_vm3, %v331_v28, %v324_v30 }
  0xb4   :  { %486 = vmatmul.msk.f32.vlgmr.msra.gmra.mxu0 %vm334_vm4, %v333_v31 }
 0x131   :  { %v354_v33 = vpop.f32.mrf.mxu0 }
 0x132   :  { %v355_v34 = vadd.f32 %v488_v32, %v354_v33 }
 0x134   :  { %357 = vst [vmem:[#allocation2] sm:$0x3] %v355_v34 }
 0x135   :  { %368 = dma.vmem_to_hbm [thread:$0]  %s364_s7, 32, %s366_s10, [#allocation3]  }
 0x136   :  { %513 = dma.done.wait [#allocation3], 32  }
 0x137   :  { %514 = vsyncadd [#allocation3], 4294967264 }
 0x138   :  { %373 = vsyncpa [#allocation3], 1 }

</bundles_post_ra>
